<compile_context>
chip_gen: v5e
topology: v5e:2x2
jax: 0.10.0
libtpu: 0.0.40
codegen_flags: <defaults>
</compile_context>

<pallas_src>
import functools

import jax
import jax.numpy as jnp
from jax.experimental import pallas as pl
from jax.experimental.pallas import tpu as pltpu

LN_EPS = 1e-5  # torch.nn.LayerNorm default


def _round_up(n, m):
    return ((n + m - 1) // m) * m


def gru_cell_kernel(xh_ref, h_ref, w_ref, p_ref, out_ref):
    """Fused GRU-cell step.

    xh_ref : (B, I+H)      concat([x, h], axis=1)
    h_ref  : (B, H)        previous hidden state
    w_ref  : (I+H, 2*NP)   block-diag [[Wi^T, 0], [0, Wh^T]], each proj padded to NP lanes
    p_ref  : (4B, NP)      rows [0,2B): gamma (x-rows then h-rows); rows [2B,4B): beta
    out_ref: (B, H)
    """
    B, H = h_ref.shape
    NP = w_ref.shape[-1] // 2

    xh = xh_ref[...].astype(jnp.float32)
    h = h_ref[...].astype(jnp.float32)

    # Single MXU push producing [x_proj | h_proj], each NP(=128)-lane aligned.
    t = jnp.dot(xh, w_ref[...].astype(jnp.float32),
                preferred_element_type=jnp.float32)            # (B, 2*NP)

    # Lane-aligned split + sublane stack -> rows [0,B) = x_proj, rows [B,2B) = h_proj.
    v = jnp.concatenate([t[:, :NP], t[:, NP:]], axis=0)        # (2B, NP)

    gamma = p_ref[:2 * B, :].astype(jnp.float32)               # (2B, NP), zero in pad lanes
    beta = p_ref[2 * B:, :].astype(jnp.float32)

    # Segmented LayerNorm with lane masks on the full (2B, NP) slab:
    #   lanes [0, 2H)  : ln_i2h (x rows) / ln_h2h (h rows)
    #   lanes [2H, 3H) : ln_cell_1 (x rows) / ln_cell_2 (h rows)
    #   lanes [3H, NP) : zero padding (gamma/beta zero there -> output 0, unused)
    lane = jax.lax.broadcasted_iota(jnp.int32, v.shape, 1)
    in_gate = lane < 2 * H
    in_cell = jnp.logical_and(lane >= 2 * H, lane < 3 * H)
    zero = jnp.zeros_like(v)

    mean_g = jnp.sum(jnp.where(in_gate, v, zero), axis=-1, keepdims=True) * (1.0 / (2 * H))
    mean_c = jnp.sum(jnp.where(in_cell, v, zero), axis=-1, keepdims=True) * (1.0 / H)
    mu = jnp.where(in_gate, mean_g, mean_c)
    d = v - mu
    d2 = d * d
    var_g = jnp.sum(jnp.where(in_gate, d2, zero), axis=-1, keepdims=True) * (1.0 / (2 * H))
    var_c = jnp.sum(jnp.where(in_cell, d2, zero), axis=-1, keepdims=True) * (1.0 / H)
    var = jnp.where(in_gate, var_g, var_c)
    ln = d * jax.lax.rsqrt(var + LN_EPS) * gamma + beta        # (2B, NP)

    ln_x = ln[:B, :]       # [ln_i2h | ln_cell_1 | 0]   (sublane-aligned slice)
    ln_h = ln[B:, :]       # [ln_h2h | ln_cell_2 | 0]

    gates = jax.nn.sigmoid(ln_x[:, :2 * H] + ln_h[:, :2 * H])  # (B, 2H)
    z_t = gates[:, :H]
    r_t = gates[:, H:]

    h_hat = jnp.tanh(ln_x[:, 2 * H:3 * H] + r_t * ln_h[:, 2 * H:3 * H])
    out_ref[...] = ((1.0 - z_t) * h + z_t * h_hat).astype(out_ref.dtype)


@jax.jit
def layer_normed_gru_cell(x, h, w_input, w_states,
                          g_i2h, b_i2h, g_h2h, b_h2h,
                          g_c1, b_c1, g_c2, b_c2):
    """Mirrors LayerNormedGRUCell.forward(x, h) with PyTorch-layout parameters.

    w_input : (3H, I)   input_transform.weight
    w_states: (3H, H)   states_transform.weight
    LayerNorm gammas/betas are the natural 1-D (2H,) / (H,) vectors.
    """
    B, I = x.shape
    _, H = h.shape
    dtype = x.dtype
    NP = _round_up(3 * H, 128)     # pad each projection to a 128-lane-aligned block

    # Fused block-diagonal projection weight, built once per call.
    w_fused = jnp.zeros((I + H, 2 * NP), dtype)
    w_fused = w_fused.at[:I, :3 * H].set(w_input.T.astype(dtype))
    w_fused = w_fused.at[I:, NP:NP + 3 * H].set(w_states.T.astype(dtype))

    def _row(g2h, gcell):
        r = jnp.zeros((NP,), dtype)
        r = r.at[:2 * H].set(g2h.astype(dtype))
        r = r.at[2 * H:3 * H].set(gcell.astype(dtype))
        return r

    gamma_x = _row(g_i2h, g_c1)
    gamma_h = _row(g_h2h, g_c2)
    beta_x = _row(b_i2h, b_c1)
    beta_h = _row(b_h2h, b_c2)
    # One packed LN-parameter slab: rows [0,2B) gamma (x rows then h rows), [2B,4B) beta.
    params = jnp.concatenate([
        jnp.broadcast_to(gamma_x, (B, NP)),
        jnp.broadcast_to(gamma_h, (B, NP)),
        jnp.broadcast_to(beta_x, (B, NP)),
        jnp.broadcast_to(beta_h, (B, NP)),
    ], axis=0)                                                  # (4B, NP)

    xh = jnp.concatenate([x, h], axis=1)                        # (B, I+H)

    itemsize = jnp.dtype(dtype).itemsize
    cost = pl.CostEstimate(
        flops=2 * B * (I + H) * (2 * NP) + 24 * B * NP,
        transcendentals=B * (2 * H + H) + 2 * B,                # sigmoid + tanh + rsqrt
        bytes_accessed=(xh.size + h.size + w_fused.size + params.size + B * H) * itemsize,
    )

    vmem = pl.BlockSpec(memory_space=pltpu.MemorySpace.VMEM)
    return pl.pallas_call(
        gru_cell_kernel,
        out_shape=jax.ShapeDtypeStruct((B, H), dtype),
        in_specs=[vmem, vmem, vmem, vmem],
        out_specs=vmem,
        cost_estimate=cost,
    )(xh, h, w_fused, params)


def _reference(x, h, w_input, w_states,
               g_i2h, b_i2h, g_h2h, b_h2h, g_c1, b_c1, g_c2, b_c2):
    """Literal JAX translation of the PyTorch module's forward."""
    H = h.shape[-1]

    def ln(v, g, b):
        mu = jnp.mean(v, axis=-1, keepdims=True)
        var = jnp.mean((v - mu) ** 2, axis=-1, keepdims=True)
        return (v - mu) / jnp.sqrt(var + LN_EPS) * g + b

    hi = jax.lax.Precision.HIGHEST
    x_t = jnp.dot(x, w_input.T, precision=hi)
    h_t = jnp.dot(h, w_states.T, precision=hi)
    i2h = ln(x_t[:, :2 * H], g_i2h, b_i2h)
    h2h = ln(h_t[:, :2 * H], g_h2h, b_h2h)
    gates = jax.nn.sigmoid(i2h + h2h)
    z_t, r_t = gates[:, :H], gates[:, H:]
    c1 = ln(x_t[:, 2 * H:], g_c1, b_c1)
    c2 = ln(h_t[:, 2 * H:], g_c2, b_c2)
    h_hat = jnp.tanh(c1 + r_t * c2)
    return (1.0 - z_t) * h + z_t * h_hat


if __name__ == "__main__":
    B, INPUT_SIZE, HIDDEN_SIZE = 8, 32, 32
    H = HIDDEN_SIZE

    key = jax.random.PRNGKey(0)
    kx, kh, kwi, kwh, kg = jax.random.split(key, 5)

    x = jax.random.normal(kx, (B, INPUT_SIZE), dtype=jnp.float32)
    h = jax.random.normal(kh, (B, HIDDEN_SIZE), dtype=jnp.float32)

    # input_transform.weight: (3H, I), xavier-uniform fan-in style init.
    bound = (3.0 / INPUT_SIZE) ** 0.5
    w_input = jax.random.uniform(kwi, (3 * H, INPUT_SIZE),
                                 minval=-bound, maxval=bound, dtype=jnp.float32)
    # states_transform.weight: (3H, H), orthogonal init via QR.
    a = jax.random.normal(kwh, (3 * H, HIDDEN_SIZE), dtype=jnp.float32)
    q, r = jnp.linalg.qr(a)
    w_states = q * jnp.sign(jnp.diag(r))[None, :]

    # LayerNorm affine params (default init is gamma=1, beta=0; perturb them here so
    # the affine path is actually exercised by the check).
    kgs = jax.random.split(kg, 8)
    g_i2h = 1.0 + 0.1 * jax.random.normal(kgs[0], (2 * H,), jnp.float32)
    b_i2h = 0.1 * jax.random.normal(kgs[1], (2 * H,), jnp.float32)
    g_h2h = 1.0 + 0.1 * jax.random.normal(kgs[2], (2 * H,), jnp.float32)
    b_h2h = 0.1 * jax.random.normal(kgs[3], (2 * H,), jnp.float32)
    g_c1 = 1.0 + 0.1 * jax.random.normal(kgs[4], (H,), jnp.float32)
    b_c1 = 0.1 * jax.random.normal(kgs[5], (H,), jnp.float32)
    g_c2 = 1.0 + 0.1 * jax.random.normal(kgs[6], (H,), jnp.float32)
    b_c2 = 0.1 * jax.random.normal(kgs[7], (H,), jnp.float32)

    args = (x, h, w_input, w_states,
            g_i2h, b_i2h, g_h2h, b_h2h, g_c1, b_c1, g_c2, b_c2)

    out = layer_normed_gru_cell(*args)
    out = jax.block_until_ready(out)

    ref = _reference(*args)
    assert out.shape == (B, HIDDEN_SIZE)
    assert jnp.allclose(out, ref, atol=1e-4, rtol=1e-4), "mismatch vs reference"

    print("KERNEL_OK")
</pallas_src>

<mosaic_0001>
module attributes {stable_mosaic.version = 11 : i64} {
  func.func @gru_cell_kernel(%arg0: memref<8x64xf32, #tpu.memory_space<vmem>>, %arg1: memref<8x32xf32, #tpu.memory_space<vmem>>, %arg2: memref<64x256xf32, #tpu.memory_space<vmem>>, %arg3: memref<32x128xf32, #tpu.memory_space<vmem>>, %arg4: memref<8x32xf32, #tpu.memory_space<vmem>>) attributes {dimension_semantics = [], scalar_prefetch = 0 : i64, scratch_operands = 0 : i64, tpu.core_type = #tpu.core_type<tc>} {
    %c0 = arith.constant 0 : index
    %c0_0 = arith.constant 0 : index
    %0 = vector.load %arg0[%c0, %c0_0] : memref<8x64xf32, #tpu.memory_space<vmem>>, vector<8x64xf32>
    %c0_1 = arith.constant 0 : index
    %c0_2 = arith.constant 0 : index
    %1 = vector.load %arg1[%c0_1, %c0_2] : memref<8x32xf32, #tpu.memory_space<vmem>>, vector<8x32xf32>
    %c0_3 = arith.constant 0 : index
    %c0_4 = arith.constant 0 : index
    %2 = vector.load %arg2[%c0_3, %c0_4] : memref<64x256xf32, #tpu.memory_space<vmem>>, vector<64x256xf32>
    %cst = arith.constant dense<0.000000e+00> : vector<8x256xf32>
    %3 = tpu.matmul %0, %2, %cst {dimension_numbers = #tpu.dot_dimension_numbers<[1], [0], [0], [1], [0, 0, 1, 1], [], []>} : vector<8x64xf32>, vector<64x256xf32>, vector<8x256xf32> -> vector<8x256xf32>
    %4 = vector.extract_strided_slice %3 {offsets = [0, 0], sizes = [8, 128], strides = [1, 1]} : vector<8x256xf32> to vector<8x128xf32>
    %5 = vector.extract_strided_slice %3 {offsets = [0, 128], sizes = [8, 128], strides = [1, 1]} : vector<8x256xf32> to vector<8x128xf32>
    %6 = tpu.concatenate %4, %5 in 0 : vector<8x128xf32>, vector<8x128xf32> -> vector<16x128xf32>
    %c0_5 = arith.constant 0 : index
    %c0_6 = arith.constant 0 : index
    %7 = vector.load %arg3[%c0_5, %c0_6] : memref<32x128xf32, #tpu.memory_space<vmem>>, vector<16x128xf32>
    %c16 = arith.constant 16 : index
    %c0_7 = arith.constant 0 : index
    %8 = vector.load %arg3[%c16, %c0_7] : memref<32x128xf32, #tpu.memory_space<vmem>>, vector<16x128xf32>
    %9 = tpu.iota {dimensions = array<i32: 1>} : vector<16x128xi32>
    %c64_i32 = arith.constant 64 : i32
    %10 = vector.broadcast %c64_i32 : i32 to vector<16x128xi32>
    %11 = arith.cmpi slt, %9, %10 : vector<16x128xi32>
    %c64_i32_8 = arith.constant 64 : i32
    %12 = vector.broadcast %c64_i32_8 : i32 to vector<16x128xi32>
    %13 = arith.cmpi sge, %9, %12 : vector<16x128xi32>
    %c96_i32 = arith.constant 96 : i32
    %14 = vector.broadcast %c96_i32 : i32 to vector<16x128xi32>
    %15 = arith.cmpi slt, %9, %14 : vector<16x128xi32>
    %16 = arith.andi %13, %15 : vector<16x128xi1>
    %cst_9 = arith.constant 0.000000e+00 : f32
    %17 = vector.broadcast %cst_9 : f32 to vector<16x128xf32>
    %18 = arith.select %11, %6, %17 : vector<16x128xi1>, vector<16x128xf32>
    %cst_10 = arith.constant dense<0.000000e+00> : vector<16xf32>
    %19 = vector.multi_reduction <add>, %18, %cst_10 [1] : vector<16x128xf32> to vector<16xf32>
    %20 = vector.shape_cast %19 : vector<16xf32> to vector<16x1xf32>
    %cst_11 = arith.constant 1.562500e-02 : f32
    %21 = vector.broadcast %cst_11 : f32 to vector<16x1xf32>
    %22 = arith.mulf %20, %21 : vector<16x1xf32>
    %23 = arith.select %16, %6, %17 : vector<16x128xi1>, vector<16x128xf32>
    %cst_12 = arith.constant dense<0.000000e+00> : vector<16xf32>
    %24 = vector.multi_reduction <add>, %23, %cst_12 [1] : vector<16x128xf32> to vector<16xf32>
    %25 = vector.shape_cast %24 : vector<16xf32> to vector<16x1xf32>
    %cst_13 = arith.constant 3.125000e-02 : f32
    %26 = vector.broadcast %cst_13 : f32 to vector<16x1xf32>
    %27 = arith.mulf %25, %26 : vector<16x1xf32>
    %28 = vector.shape_cast %22 : vector<16x1xf32> to vector<16x1xf32>
    %29 = vector.broadcast %28 : vector<16x1xf32> to vector<16x128xf32>
    %30 = vector.shape_cast %27 : vector<16x1xf32> to vector<16x1xf32>
    %31 = vector.broadcast %30 : vector<16x1xf32> to vector<16x128xf32>
    %32 = arith.select %11, %29, %31 : vector<16x128xi1>, vector<16x128xf32>
    %33 = arith.subf %6, %32 : vector<16x128xf32>
    %34 = arith.mulf %33, %33 : vector<16x128xf32>
    %35 = arith.select %11, %34, %17 : vector<16x128xi1>, vector<16x128xf32>
    %cst_14 = arith.constant dense<0.000000e+00> : vector<16xf32>
    %36 = vector.multi_reduction <add>, %35, %cst_14 [1] : vector<16x128xf32> to vector<16xf32>
    %37 = vector.shape_cast %36 : vector<16xf32> to vector<16x1xf32>
    %cst_15 = arith.constant 1.562500e-02 : f32
    %38 = vector.broadcast %cst_15 : f32 to vector<16x1xf32>
    %39 = arith.mulf %37, %38 : vector<16x1xf32>
    %40 = arith.select %16, %34, %17 : vector<16x128xi1>, vector<16x128xf32>
    %cst_16 = arith.constant dense<0.000000e+00> : vector<16xf32>
    %41 = vector.multi_reduction <add>, %40, %cst_16 [1] : vector<16x128xf32> to vector<16xf32>
    %42 = vector.shape_cast %41 : vector<16xf32> to vector<16x1xf32>
    %cst_17 = arith.constant 3.125000e-02 : f32
    %43 = vector.broadcast %cst_17 : f32 to vector<16x1xf32>
    %44 = arith.mulf %42, %43 : vector<16x1xf32>
    %45 = vector.shape_cast %39 : vector<16x1xf32> to vector<16x1xf32>
    %46 = vector.broadcast %45 : vector<16x1xf32> to vector<16x128xf32>
    %47 = vector.shape_cast %44 : vector<16x1xf32> to vector<16x1xf32>
    %48 = vector.broadcast %47 : vector<16x1xf32> to vector<16x128xf32>
    %49 = arith.select %11, %46, %48 : vector<16x128xi1>, vector<16x128xf32>
    %cst_18 = arith.constant 9.99999974E-6 : f32
    %50 = vector.broadcast %cst_18 : f32 to vector<16x128xf32>
    %51 = arith.addf %49, %50 : vector<16x128xf32>
    %52 = math.rsqrt %51 : vector<16x128xf32>
    %53 = arith.mulf %33, %52 : vector<16x128xf32>
    %54 = arith.mulf %53, %7 : vector<16x128xf32>
    %55 = arith.addf %54, %8 : vector<16x128xf32>
    %56 = vector.extract_strided_slice %55 {offsets = [0, 0], sizes = [8, 128], strides = [1, 1]} : vector<16x128xf32> to vector<8x128xf32>
    %57 = vector.extract_strided_slice %55 {offsets = [8, 0], sizes = [8, 128], strides = [1, 1]} : vector<16x128xf32> to vector<8x128xf32>
    %58 = vector.extract_strided_slice %56 {offsets = [0, 0], sizes = [8, 64], strides = [1, 1]} : vector<8x128xf32> to vector<8x64xf32>
    %59 = vector.extract_strided_slice %57 {offsets = [0, 0], sizes = [8, 64], strides = [1, 1]} : vector<8x128xf32> to vector<8x64xf32>
    %60 = arith.addf %58, %59 : vector<8x64xf32>
    %61 = arith.negf %60 : vector<8x64xf32>
    %62 = math.exp %61 : vector<8x64xf32>
    %cst_19 = arith.constant 1.000000e+00 : f32
    %63 = vector.broadcast %cst_19 : f32 to vector<8x64xf32>
    %64 = arith.addf %63, %62 : vector<8x64xf32>
    %65 = arith.divf %63, %64 : vector<8x64xf32>
    %66 = vector.extract_strided_slice %65 {offsets = [0, 0], sizes = [8, 32], strides = [1, 1]} : vector<8x64xf32> to vector<8x32xf32>
    %67 = vector.extract_strided_slice %65 {offsets = [0, 32], sizes = [8, 32], strides = [1, 1]} : vector<8x64xf32> to vector<8x32xf32>
    %68 = vector.extract_strided_slice %56 {offsets = [0, 64], sizes = [8, 32], strides = [1, 1]} : vector<8x128xf32> to vector<8x32xf32>
    %69 = vector.extract_strided_slice %57 {offsets = [0, 64], sizes = [8, 32], strides = [1, 1]} : vector<8x128xf32> to vector<8x32xf32>
    %70 = arith.mulf %67, %69 : vector<8x32xf32>
    %71 = arith.addf %68, %70 : vector<8x32xf32>
    %72 = math.tanh %71 : vector<8x32xf32>
    %cst_20 = arith.constant 1.000000e+00 : f32
    %73 = vector.broadcast %cst_20 : f32 to vector<8x32xf32>
    %74 = arith.subf %73, %66 : vector<8x32xf32>
    %75 = arith.mulf %74, %1 : vector<8x32xf32>
    %76 = arith.mulf %66, %72 : vector<8x32xf32>
    %77 = arith.addf %75, %76 : vector<8x32xf32>
    %c0_21 = arith.constant 0 : index
    %c0_22 = arith.constant 0 : index
    %78 = vector.load %arg4[%c0_21, %c0_22] : memref<8x32xf32, #tpu.memory_space<vmem>>, vector<8x32xf32>
    tpu.vector_store %arg4[%c0_21, %c0_22], %77 {strides = array<i32>} : memref<8x32xf32, #tpu.memory_space<vmem>>, vector<8x32xf32>,
    return
  }
}

</mosaic_0001>

<bundles_post_ra>
// kernel: layer_normed_gru_cell.1
= control target key start
LH: loop header
LB: loop body
LE: loop exit
PB: predicated region body
PF: predicated region fallthrough
CT: control target
= control target key end

     0   :  { %s376_s0 = inlined_call_operand.vmem [shape: f32[8,64], index: 0, kind: input, shape index: {}]   ;;  %s377_s1 = inlined_call_operand.vmem [shape: f32[8,32], index: 1, kind: input, shape index: {}]   ;;  %s378_s2 = inlined_call_operand.vmem [shape: f32[64,256], index: 2, kind: input, shape index: {}]   ;;  %s379_s3 = inlined_call_operand.vmem [shape: f32[32,128], index: 3, kind: input, shape index: {}]   ;;  %s380_s4 = inlined_call_operand.hbm [shape: f32[8,32], index: 4, kind: output, shape index: {}]  }
   0x1   :  { %v34_v0 = vld [vmem:[%s378_s2 + $0x70] sm:$0xff]  ;;  %v35_v1 = vld [vmem:[%s378_s2 + $0x78] sm:$0xff]  ;;  %v32_v2 = vld [vmem:[%s378_s2 + $0x60] sm:$0xff] }
   0x2   :  { %48 = vmatpush.msra.mxu0 %v34_v0  ;;  %68 = vmatpush.msra.mxu1 %v35_v1  ;;  %v33_v3 = vld [vmem:[%s378_s2 + $0x68] sm:$0xff]  ;;  %v30_v4 = vld [vmem:[%s378_s2 + $0x50] sm:$0xff]  ;;  %v31_v5 = vld [vmem:[%s378_s2 + $0x58] sm:$0xff] }
   0x3   :  { %v28_v6 = vld [vmem:[%s378_s2 + $0x40] sm:$0xff]  ;;  %v29_v7 = vld [vmem:[%s378_s2 + $0x48] sm:$0xff] }
   0x4   :  { %49 = vmatpush.msra.mxu0 %v32_v2  ;;  %69 = vmatpush.msra.mxu1 %v33_v3 }
   0x6   :  { %50 = vmatpush.msra.mxu0 %v30_v4  ;;  %70 = vmatpush.msra.mxu1 %v31_v5 }
   0x7   :  { %9 = vsyncpa [#allocation3], 0  ;;  %v26_v8 = vld [vmem:[%s378_s2 + $0x30] sm:$0xff]  ;;  %v27_v9 = vld [vmem:[%s378_s2 + $0x38] sm:$0xff]  ;;  %vm36_vm0 = vcmask 523264   ;;  %v84_v17 = vlaneseq  ;;  %s258_s25 = smov 96  }
   0x8   :  { %51 = vmatpush.msra.mxu0 %v28_v6  ;;  %71 = vmatpush.msra.mxu1 %v29_v7  ;;  %v24_v10 = vld [vmem:[%s378_s2 + $0x20] sm:$0xff]  ;;  %v25_v11 = vld [vmem:[%s378_s2 + $0x28] sm:$0xff]  ;;  %v22_v12 = vld [vmem:[%s378_s2 + $0x10] sm:$0xff]  ;;  %s260_s30 = smov 64   ;;  %s261_s7 = smov [#allocation2]   ;;  %vm197_vm15 = vcmask 261120  }
   0x9   :  { %v23_v13 = vld [vmem:[%s378_s2 + $0x18] sm:$0xff]  ;;  %v20_v14 = vld [vmem:[%s378_s2] sm:$0xff]  ;;  %v21_v15 = vld [vmem:[%s378_s2 + $0x8] sm:$0xff]  ;;  %v85_v18 = vand.u32 127, %v84_v17  ;;  %s204_s8 = sshll.u32 %s261_s7, 4  ;;  %s206_s11 = sshll.u32 %s380_s4, 4  ;;  %s205_s8 = int_to_ptr.vmem [resolvable:$true] %s204_s8  ;;  %s207_s11 = int_to_ptr.hbm [resolvable:$true] %s206_s11 }
   0xa   :  { %52 = vmatpush.msra.mxu0 %v26_v8  ;;  %72 = vmatpush.msra.mxu1 %v27_v9  ;;  %v18_v16 = vld [vmem:[%s376_s0] sm:$0xff]  ;;  %v81_v61 = vld [vmem:[%s379_s3 + $0x8] sm:$0xff]  ;;  %v83_v1 = vld [vmem:[%s379_s3 + $0x18] sm:$0xff] }
   0xb   :  { %vm86_vm1 = vcmp.lt.s32.totalorder %v85_v18, 64  ;;  %vm87_vm2 = vcmp.ge.s32.totalorder %v85_v18, 64  ;;  %vm88_vm3 = vcmp.lt.s32.totalorder %v85_v18, 96 }
   0xc   :  { %53 = vmatpush.msra.mxu0 %v24_v10  ;;  %73 = vmatpush.msra.mxu1 %v25_v11  ;;  %vm340_vm4 = vmand %vm87_vm2, %vm88_vm3 }
   0xe   :  { %54 = vmatpush.msra.mxu0 %v22_v12  ;;  %74 = vmatpush.msra.mxu1 %v23_v13  ;;  %v80_v12 = vld [vmem:[%s379_s3] sm:$0xff] }
  0x10   :  { %55 = vmatpush.msra.mxu0 %v20_v14  ;;  %75 = vmatpush.msra.mxu1 %v21_v15  ;;  %v82_v14 = vld [vmem:[%s379_s3 + $0x10] sm:$0xff]  ;;  %s259_s3 = smov 32  }
  0x11   :  { %215 = vmatmul.msk.f32.vlgmr.msra.gmra.mxu0 %vm36_vm0, %v18_v16  ;;  %216 = vmatmul.msk.f32.vlgmr.msra.gmra.mxu1 %vm36_vm0, %v18_v16 }
  0x8e   :  { %v57_v19 = vpop.f32.mrf.mxu0  ;;  %v77_v20 = vpop.f32.mrf.mxu1 }
  0x8f   :  { %v91_v21 = vsel %vm86_vm1, %v77_v20, 0.0  ;;  %v90_v22 = vsel %vm86_vm1, %v57_v19, 0.0  ;;  %v98_v24 = vsel %vm340_vm4, %v57_v19, 0.0  ;;  %v99_v25 = vsel %vm340_vm4, %v77_v20, 0.0 }
  0x90   :  { %94 = vadd.xlane.f32.xlu0 %v91_v21  ;;  %92 = vadd.xlane.f32.xlu1 %v90_v22 }
  0x98   :  { %102 = vadd.xlane.f32.xlu0 %v99_v25  ;;  %100 = vadd.xlane.f32.xlu1 %v98_v24 }
 0x103   :  { %v95_v26 = vpop.xlane.xlu0 %94  ;;  %v93_v27 = vpop.xlane.xlu1 %92 }
 0x104   :  { %v96_v28 = vmul.f32 0.015625, %v93_v27  ;;  %v97_v31 = vmul.f32 0.015625, %v95_v26 }
 0x10b   :  { %v103_v29 = vpop.xlane.xlu0 %102  ;;  %v101_v30 = vpop.xlane.xlu1 %100 }
 0x10c   :  { %v105_v32 = vmul.f32 0.03125, %v103_v29  ;;  %v104_v33 = vmul.f32 0.03125, %v101_v30 }
 0x10e   :  { %v106_v34 = vsel %vm86_vm1, %v96_v28, %v104_v33  ;;  %v107_v35 = vsel %vm86_vm1, %v97_v31, %v105_v32 }
 0x10f   :  { %v109_v36 = vsub.f32 %v77_v20, %v107_v35  ;;  %v108_v37 = vsub.f32 %v57_v19, %v106_v34 }
 0x111   :  { %v111_v38 = vmul.f32 %v109_v36, %v109_v36  ;;  %v110_v39 = vmul.f32 %v108_v37, %v108_v37 }
 0x113   :  { %v113_v40 = vsel %vm86_vm1, %v111_v38, 0.0  ;;  %v120_v41 = vsel %vm340_vm4, %v110_v39, 0.0  ;;  %v112_v42 = vsel %vm86_vm1, %v110_v39, 0.0  ;;  %v121_v43 = vsel %vm340_vm4, %v111_v38, 0.0 }
 0x114   :  { %116 = vadd.xlane.f32.xlu2 %v113_v40  ;;  %122 = vadd.xlane.f32.xlu1 %v120_v41 }
 0x115   :  { %114 = vadd.xlane.f32.xlu0 %v112_v42 }
 0x11c   :  { %124 = vadd.xlane.f32.xlu2 %v121_v43 }
 0x187   :  { %v117_v44 = vpop.xlane.xlu2 %116  ;;  %v123_v52 = vpop.xlane.xlu1 %122 }
 0x188   :  { %v119_v46 = vmul.f32 0.015625, %v117_v44  ;;  %v115_v53 = vpop.xlane.xlu0 %114  ;;  %v126_v56 = vmul.f32 0.03125, %v123_v52 }
 0x189   :  { %v118_v57 = vmul.f32 0.015625, %v115_v53 }
 0x18b   :  { %v128_v60 = vsel %vm86_vm1, %v118_v57, %v126_v56 }
 0x18c   :  { %v130_v0 = vadd.f32 1e-05, %v128_v60 }
 0x18e   :  { %vm138_vm9 = vweird.f32 %v130_v0 }
 0x18f   :  { %v125_v45 = vpop.xlane.xlu2 %124 }
 0x190   :  { %v127_v47 = vmul.f32 0.03125, %v125_v45 }
 0x192   :  { %v129_v48 = vsel %vm86_vm1, %v119_v46, %v127_v47 }
 0x193   :  { %v131_v49 = vadd.f32 1e-05, %v129_v48 }
 0x195   :  { %222 = vrsqrt.f32 %v131_v49  ;;  %vm148_vm6 = vweird.f32 %v131_v49 }
 0x196   :  { %224 = vrsqrt.f32 %v130_v0 }
 0x19b   :  { %v223_v50 = vpop.eup %222 }
 0x19c   :  { %v143_v51 = vmul.f32 %v223_v50, %v131_v49  ;;  %vm149_vm5 = vweird.f32 %v223_v50  ;;  %v225_v4 = vpop.eup %224 }
 0x19d   :  { %vm150_vm7 = vmor %vm148_vm6, %vm149_vm5  ;;  %v133_v5 = vmul.f32 %v225_v4, %v130_v0  ;;  %vm139_vm8 = vweird.f32 %v225_v4 }
 0x19e   :  { %v144_v54 = vmul.f32 %v223_v50, %v143_v51  ;;  %vm140_vm10 = vmor %vm138_vm9, %vm139_vm8 }
 0x19f   :  { %v134_v6 = vmul.f32 %v225_v4, %v133_v5 }
 0x1a0   :  { %v145_v55 = vmul.f32 0.5, %v144_v54 }
 0x1a1   :  { %v135_v7 = vmul.f32 0.5, %v134_v6 }
 0x1a2   :  { %v146_v58 = vsub.f32 1.5, %v145_v55 }
 0x1a3   :  { %v136_v8 = vsub.f32 1.5, %v135_v7 }
 0x1a4   :  { %v147_v59 = vmul.f32 %v223_v50, %v146_v58 }
 0x1a5   :  { %v137_v9 = vmul.f32 %v225_v4, %v136_v8 }
 0x1a6   :  { %v151_v62 = vsel %vm150_vm7, %v223_v50, %v147_v59 }
 0x1a7   :  { %v153_v63 = vmul.f32 %v151_v62, %v109_v36  ;;  %v141_v10 = vsel %vm140_vm10, %v225_v4, %v137_v9  ;;  %v19_v36 = vld [vmem:[%s377_s1] sm:$0xff] }
 0x1a8   :  { %v152_v11 = vmul.f32 %v141_v10, %v108_v37 }
 0x1a9   :  { %v155_v2 = vmul.f32 %v153_v63, %v81_v61 }
 0x1aa   :  { %v154_v13 = vmul.f32 %v152_v11, %v80_v12 }
 0x1ab   :  { %v157_v3 = vadd.f32 %v155_v2, %v83_v1 }
 0x1ac   :  { %v156_v15 = vadd.f32 %v154_v13, %v82_v14 }
 0x1ad   :  { %179 = vrot.lane.b32.xlu2 %v157_v3, %s258_s25 }
 0x1ae   :  { %v158_v16 = vadd.f32 %v157_v3, %v156_v15 }
 0x1b0   :  { %v217_v17 = vmul.f32 -1.442695, %v158_v16 }
 0x1b2   :  { %226 = vpow2.f32 %v217_v17 }
 0x1b8   :  { %v227_v18 = vpop.eup %226 }
 0x1b9   :  { %v162_v19 = vadd.f32 1.0, %v227_v18 }
 0x1bb   :  { %228 = vrcp.f32 %v162_v19  ;;  %v174_v25 = vand.u32 2147483648, %v162_v19  ;;  %vm168_vm12 = vweird.f32 %v162_v19  ;;  %v172_v26 = vand.u32 2147483647, %v162_v19 }
 0x1bd   :  { %v175_v28 = vor.u32 1.1754944e-38, %v174_v25  ;;  %vm173_vm14 = vcmp.eq.f32.partialorder %v172_v26, 8.507059e+37 }
 0x1c1   :  { %v229_v20 = vpop.eup %228 }
 0x1c2   :  { %v164_v21 = vmul.f32 %v229_v20, %v162_v19  ;;  %vm169_vm11 = vweird.f32 %v229_v20 }
 0x1c3   :  { %vm170_vm13 = vmor %vm168_vm12, %vm169_vm11 }
 0x1c4   :  { %v165_v22 = vsub.f32 1.0, %v164_v21 }
 0x1c6   :  { %v166_v23 = vmul.f32 %v229_v20, %v165_v22 }
 0x1c8   :  { %v167_v24 = vadd.f32 %v229_v20, %v166_v23 }
 0x1ca   :  { %v171_v27 = vsel %vm170_vm13, %v229_v20, %v167_v24 }
 0x1cb   :  { %v176_v30 = vsel %vm173_vm14, %v175_v28, %v171_v27 }
 0x1cc   :  { %v189_v35 = vsub.f32 1.0, %v176_v30 }
 0x1ce   :  { %v190_v38 = vmul.f32 %v189_v35, %v19_v36 }
 0x207   :  { %v180_v29 = vpop.permute.xlu2 %179 }
 0x208   :  { %v182_v31 = vmul.f32 %v180_v29, %v176_v30 }
 0x20a   :  { %184 = vrot.lane.b32.xlu0 %v182_v31, %s259_s3 }
 0x27c   :  { %v185_v32 = vpop.permute.xlu0 %184 }
 0x27d   :  { %v187_v33 = vadd.f32 %v185_v32, %v156_v15 }
 0x27f   :  { %230 = vtanh.f32 %v187_v33 }
 0x285   :  { %v231_v34 = vpop.eup %230 }
 0x286   :  { %192 = vrot.lane.b32.xlu1 %v231_v34, %s260_s30 }
 0x2f8   :  { %v193_v37 = vpop.permute.xlu1 %192 }
 0x2f9   :  { %v195_v39 = vmul.f32 %v193_v37, %v176_v30 }
 0x2fb   :  { %v196_v40 = vadd.f32 %v195_v39, %v190_v38 }
 0x2fd   :  { %198 = vst.msk [vmem:[#allocation2] sm:$0xff] %vm197_vm15, %v196_v40 }
 0x2fe   :  { %209 = dma.vmem_to_hbm [thread:$0]  %s205_s8, 128, %s207_s11, [#allocation3]  }
 0x2ff   :  { %256 = dma.done.wait [#allocation3], 128  }
 0x300   :  { %257 = vsyncadd [#allocation3], 4294967168 }
 0x301   :  { %214 = vsyncpa [#allocation3], 1 }

</bundles_post_ra>
